<compile_context>
chip_gen: v6e
topology: v6e:2x2x1
jax: 0.10.0
libtpu: 0.0.40
codegen_flags: <defaults>
</compile_context>

<pallas_src>
import numpy as np

import jax
import jax.numpy as jnp
from jax.experimental import pallas as pl
from jax.experimental.pallas import tpu as pltpu


_LANES = 128
_MIN_CHUNK_BYTES = 512 << 10   # only split into multiple DMAs if each >= 512 KiB
_MAX_CHUNKS = 4                # 2-4 large chunks is enough to saturate copy BW


def _resolve_shape(shape, total):
    """Resolve a single -1 entry exactly like torch.Tensor.view does."""
    shape = tuple(int(s) for s in shape)
    if shape.count(-1) > 1:
        raise ValueError("only one dimension can be inferred")
    if -1 in shape:
        known = 1
        for s in shape:
            if s != -1:
                known *= s
        if known == 0 or total % known != 0:
            raise ValueError(f"shape {shape} is invalid for input of size {total}")
        shape = tuple(total // known if s == -1 else s for s in shape)
    if int(np.prod(shape)) != total:
        raise ValueError(f"shape {shape} is invalid for input of size {total}")
    return shape


def _leading_chunks(lead, align, row_bytes):
    """Split the leading axis into <= _MAX_CHUNKS static, `align`-aligned chunks."""
    total_bytes = lead * row_bytes
    n = int(min(_MAX_CHUNKS, max(1, total_bytes // _MIN_CHUNK_BYTES)))
    per = -(-lead // n)                      # ceil(lead / n)
    per = -(-per // align) * align           # round up to packed-tile rows
    chunks = []
    start = 0
    while start < lead:
        size = min(per, lead - start)
        chunks.append((start, size))
        start += size
    return tuple(chunks)


def _make_dma_copy_kernel(chunks, lead):
    """Kernel issuing one HBM->HBM DMA per (static) chunk, then waiting on all."""

    def kernel(x_hbm, o_hbm, sem):
        copies = []
        for c, (start, size) in enumerate(chunks):
            if start == 0 and size == lead:
                src, dst = x_hbm, o_hbm              # whole-array copy
            else:
                src = x_hbm.at[pl.ds(start, size)]
                dst = o_hbm.at[pl.ds(start, size)]
            cp = pltpu.make_async_copy(src, dst, sem.at[c])
            cp.start()
            copies.append(cp)
        for cp in copies:
            cp.wait()

    return kernel


def _dma_materialize(x):
    """Fresh HBM buffer holding x's contents via direct HBM->HBM DMA."""
    total = int(np.prod(x.shape))
    itemsize = int(np.dtype(x.dtype).itemsize)
    # Packed HBM tile row count per dtype: 8 (f32), 16 (bf16), 32 (int8/fp8).
    sublane_mult = max(8, 32 // itemsize)

    if total % _LANES == 0:
        rows = total // _LANES
        src = x.reshape(rows, _LANES)                # zero-cost row-major bitcast
        chunks = _leading_chunks(rows, sublane_mult, _LANES * itemsize)
    else:
        src = x.reshape(total)                       # odd sizes: one flat DMA
        chunks = ((0, total),)
    lead = src.shape[0]

    out = pl.pallas_call(
        _make_dma_copy_kernel(chunks, lead),
        out_shape=jax.ShapeDtypeStruct(src.shape, src.dtype),
        in_specs=[pl.BlockSpec(memory_space=pl.ANY)],
        out_specs=pl.BlockSpec(memory_space=pl.ANY),
        scratch_shapes=[pltpu.SemaphoreType.DMA((len(chunks),))],
        cost_estimate=pl.CostEstimate(
            flops=0,
            transcendentals=0,
            bytes_accessed=2 * total * itemsize,
        ),
    )(src)
    return out


def pallas_view(x, shape, materialize=False):
    """Equivalent of torch `View(shape)(x)`.

    Default: metadata-only row-major reshape (exactly what torch .view means).
    materialize=True: return a freshly materialized buffer, copied by the
    direct HBM->HBM DMA Pallas kernel.
    """
    total = int(np.prod(x.shape))
    target = _resolve_shape(shape, total)
    if not materialize or total == 0:
        return x.reshape(target)
    return _dma_materialize(x).reshape(target)


class ViewPallas:
    """Mirror of the PyTorch `View` module."""

    def __init__(self, shape, materialize=False):
        self.shape = tuple(shape)
        self.materialize = materialize

    def __call__(self, x):
        return pallas_view(x, self.shape, materialize=self.materialize)


if __name__ == "__main__":
    key = jax.random.PRNGKey(0)

    # Small NCHW-style input, same convention as the torch module's typical
    # use inside the cGAN: flatten feature maps with View((-1, C*H*W)).
    B, C, H, W = 2, 4, 16, 16
    x = jax.random.normal(key, (B, C, H, W), dtype=jnp.float32)
    y_ref = x.reshape(-1, C * H * W)

    # Default path: metadata-only reshape (torch .view semantics, zero traffic).
    mod = ViewPallas((-1, C * H * W))
    y = jax.block_until_ready(mod(x))
    assert y.shape == (B, C * H * W), y.shape
    assert y.dtype == x.dtype
    np.testing.assert_array_equal(np.asarray(y), np.asarray(y_ref))

    # Materialized path: direct HBM->HBM DMA copy kernel (lane-dense slab).
    y_mat = jax.block_until_ready(
        ViewPallas((-1, C * H * W), materialize=True)(x))
    assert y_mat.shape == (B, C * H * W) and y_mat.dtype == x.dtype
    np.testing.assert_array_equal(np.asarray(y_mat), np.asarray(y_ref))

    # Materialized path, odd element count (single whole-array flat DMA).
    x2 = jax.random.normal(jax.random.PRNGKey(1), (3, 5, 7), dtype=jnp.float32)
    y2 = jax.block_until_ready(ViewPallas((-1,), materialize=True)(x2))
    np.testing.assert_array_equal(np.asarray(y2), np.asarray(x2.reshape(-1)))

    # Materialized path, 2 MiB input -> 4 parallel chunked DMAs.
    x3 = jax.random.normal(jax.random.PRNGKey(2), (4, 8, 128, 128),
                           dtype=jnp.float32)
    y3 = jax.block_until_ready(ViewPallas((4, -1), materialize=True)(x3))
    np.testing.assert_array_equal(np.asarray(y3), np.asarray(x3.reshape(4, -1)))

    print("KERNEL_OK")
</pallas_src>

<mosaic_0001>
module attributes {stable_mosaic.version = 11 : i64} {
  func.func @kernel(%arg0: memref<16x128xf32, #tpu.memory_space<any>>, %arg1: memref<16x128xf32, #tpu.memory_space<any>>, %arg2: memref<1x!tpu.dma_semaphore, #tpu.memory_space<semaphore_mem>>) attributes {dimension_semantics = [], scalar_prefetch = 0 : i64, scratch_operands = 1 : i64, tpu.core_type = #tpu.core_type<tc>} {
    %c0_i32 = arith.constant 0 : i32
    %0 = tpu.memref_slice %arg2[%c0_i32] : memref<1x!tpu.dma_semaphore, #tpu.memory_space<semaphore_mem>> -> memref<1x!tpu.dma_semaphore, #tpu.memory_space<semaphore_mem>>
    %1 = tpu.memref_squeeze %0 : memref<1x!tpu.dma_semaphore, #tpu.memory_space<semaphore_mem>> -> memref<!tpu.dma_semaphore, #tpu.memory_space<semaphore_mem>>
    tpu.enqueue_dma source(%arg0 : memref<16x128xf32, #tpu.memory_space<any>>) target(%arg1 : memref<16x128xf32, #tpu.memory_space<any>>) target_semaphore(%1 : memref<!tpu.dma_semaphore, #tpu.memory_space<semaphore_mem>>)
    %c0_i32_0 = arith.constant 0 : i32
    %2 = tpu.memref_slice %arg2[%c0_i32_0] : memref<1x!tpu.dma_semaphore, #tpu.memory_space<semaphore_mem>> -> memref<1x!tpu.dma_semaphore, #tpu.memory_space<semaphore_mem>>
    %3 = tpu.memref_squeeze %2 : memref<1x!tpu.dma_semaphore, #tpu.memory_space<semaphore_mem>> -> memref<!tpu.dma_semaphore, #tpu.memory_space<semaphore_mem>>
    tpu.wait_dma2 semaphore(%3 : memref<!tpu.dma_semaphore, #tpu.memory_space<semaphore_mem>>) src(%arg0 : memref<16x128xf32, #tpu.memory_space<any>>) dst(%arg1 : memref<16x128xf32, #tpu.memory_space<any>>)
    return
  }
}

</mosaic_0001>

<bundles_post_ra>
// kernel: tpu_custom_call.1
= control target key start
LH: loop header
LB: loop body
LE: loop exit
PB: predicated region body
PF: predicated region fallthrough
CT: control target
= control target key end

     0   :  { %s28_s6 = smov [#allocation2]   ;;  %s29_s7 = smov 131072   ;;  %s47_s0 = inlined_call_operand.hbm [shape: f32[16,128], index: 0, kind: input, shape index: {}]   ;;  %s48_s1 = inlined_call_operand.hbm [shape: f32[16,128], index: 1, kind: output, shape index: {}]  }
   0x1   :  { %s30_s8 = smov 0  }
   0x2   :  { %12 = dma.general %s47_s0, 256, %s48_s1, %s28_s6, %s29_s7, [#allocation4], %s30_s8, 0  }
   0x3   :  { %26 = dma.done.wait [#allocation2], 256 }
   0x4   :  { %27 = vsyncadd [#allocation2], 4294967040 }
   0x5   :  { %16 = vsyncmov [#allocation2] }
   0x8   :  { %s17_s13 = vpop.sfrf %16 }
   0x9   :  { %p22_p0 = scmp.ne.s32.totalorder %s17_s13, 0 }
   0xb   :  { %21 = shalt.err (%p22_p0)  }

</bundles_post_ra>
